<compile_context>
chip_gen: v7x
topology: tpu7x:2x2x1
jax: 0.10.0
libtpu: 0.0.40
codegen_flags: <defaults>
</compile_context>

<pallas_src>
import functools

import jax
import jax.numpy as jnp
from jax.experimental import pallas as pl
from jax.experimental.pallas import tpu as pltpu

LN_EPS = 1e-5  # PyTorch nn.LayerNorm default eps


def _round_up(x: int, m: int) -> int:
    return (x + m - 1) // m * m


def _pad_to(a, shape):
    pads = [(0, s - d) for d, s in zip(a.shape, shape)]
    if all(p == (0, 0) for p in pads):
        return a
    return jnp.pad(a, pads)


def _vmem_capacity_bytes() -> int:
    try:
        return int(pltpu.get_tpu_info().vmem_capacity_bytes)
    except Exception:
        return 128 << 20  # conservative v5e/v6e default


def _choose_tm(batch: int, quantum: int, block_batch: int):
    """Pick batch tile: minimize padding waste, prefer >=2 tiles (megacore), then bigger tm."""
    cand_max = max(quantum, min(block_batch, _round_up(batch, quantum)))
    best_key, best = None, None
    for tm in range(quantum, cand_max + 1, quantum):
        bp = _round_up(batch, tm)
        waste = bp - batch
        tiles = bp // tm
        key = (waste, 0 if tiles >= 2 else 1, -tm)
        if best_key is None or key < best_key:
            best_key, best = key, (tm, bp)
    return best


# ---------------------------------------------------------------------------
# Kernel
# ---------------------------------------------------------------------------
def mlp_kernel(x_ref, w1_ref, b1_ref, g_ref, beta_ref, mask_ref, w2_ref, b2_ref, o_ref,
               *, hidden_true: int, use_mask: bool, compute_dtype):
    # ---- Linear 1: [TM, Dp] @ [Dp, Hp] + [1, Hp] (f32 accumulate on MXU) ----
    h = jnp.dot(x_ref[...], w1_ref[...], preferred_element_type=jnp.float32)
    h = h + b1_ref[...]  # padded columns of w1/b1 are zero -> padded lanes of h are 0

    # ---- LayerNorm over the TRUE hidden width (padding masked by one vmul) ----
    inv_h = jnp.float32(1.0 / hidden_true)
    mean = jnp.sum(h, axis=-1, keepdims=True) * inv_h  # padded lanes contribute 0
    centered = h - mean
    if use_mask:
        centered = centered * mask_ref[...]            # zero out padded lanes
    var = jnp.sum(centered * centered, axis=-1, keepdims=True) * inv_h
    hn = centered * jax.lax.rsqrt(var + LN_EPS)        # rsqrt -> EUP slot
    hn = hn * g_ref[...] + beta_ref[...]               # padded gamma/beta are 0

    # ---- ReLU ----
    hn = jnp.maximum(hn, 0.0)

    # ---- Linear 2: [TM, Hp] @ [Hp, Op] + [1, Op] (f32 accumulate) ----
    out = jnp.dot(hn.astype(compute_dtype), w2_ref[...],
                  preferred_element_type=jnp.float32)
    out = out + b2_ref[...]
    o_ref[...] = out.astype(o_ref.dtype)


# ---------------------------------------------------------------------------
# One-time parameter preparation (hoisted out of the per-call path)
# ---------------------------------------------------------------------------
def prepare_params(w1, b1, gamma, beta, w2, b2, *, compute_dtype=jnp.bfloat16):
    """Pad feature dims to multiples of 128 and cast MXU operands once."""
    d_in, hidden = w1.shape
    d_out = w2.shape[1]
    dp = _round_up(d_in, 128)
    hp = _round_up(hidden, 128)
    op = _round_up(d_out, 128)

    w1p = _pad_to(w1, (dp, hp)).astype(compute_dtype)
    w2p = _pad_to(w2, (hp, op)).astype(compute_dtype)
    b1p = _pad_to(b1.reshape(1, -1), (1, hp)).astype(jnp.float32)
    gp = _pad_to(gamma.reshape(1, -1), (1, hp)).astype(jnp.float32)
    bep = _pad_to(beta.reshape(1, -1), (1, hp)).astype(jnp.float32)
    b2p = _pad_to(b2.reshape(1, -1), (1, op)).astype(jnp.float32)
    maskp = (jnp.arange(hp) < hidden).astype(jnp.float32).reshape(1, hp)

    meta = dict(d_in=d_in, hidden=hidden, d_out=d_out,
                dp=dp, hp=hp, op=op, compute_dtype=compute_dtype)
    return (w1p, b1p, gp, bep, maskp, w2p, b2p), meta


# ---------------------------------------------------------------------------
# Forward wrapper
# ---------------------------------------------------------------------------
def mlp_layer_prepared(x, prepared, meta, *, block_batch=None, out_dtype=jnp.float32):
    """Fused MLPLayer forward on pre-padded params. x: [B, input_dim] -> [B, output_dim]."""
    w1p, b1p, gp, bep, maskp, w2p, b2p = prepared
    compute_dtype = meta["compute_dtype"]
    dp, hp, op = meta["dp"], meta["hp"], meta["op"]
    hidden = meta["hidden"]

    B, d_in = x.shape
    assert d_in == meta["d_in"], "input_dim mismatch with prepared params"

    cbytes = jnp.dtype(compute_dtype).itemsize
    quantum = {4: 8, 2: 16, 1: 32}.get(cbytes, 8)     # sublane packing per dtype width
    if block_batch is None:
        block_batch = 128 if hp >= 8192 else 256      # keep f32 LN intermediates small for v7x
    tm, bp = _choose_tm(B, quantum, block_batch)
    grid = (bp // tm,)

    xp = _pad_to(x, (bp, dp)).astype(compute_dtype)

    # VMEM budget: double-buffered x/out tiles, single-buffered resident weights,
    # small (8-sublane-padded) vectors, f32 LN intermediates.
    obytes = jnp.dtype(out_dtype).itemsize
    vmem_need = (2 * tm * dp * cbytes
                 + 2 * tm * op * obytes
                 + (dp * hp + hp * op) * cbytes
                 + 8 * (4 * hp + op) * 4
                 + 4 * tm * hp * 4)
    cap = int(_vmem_capacity_bytes() * 0.82)          # ~105 MiB v5e/v6e, ~52 MiB v7x
    vmem_limit = int(min(max(vmem_need + (4 << 20), 16 << 20), cap))

    flops = 2 * bp * (dp * hp + hp * op)
    bytes_accessed = (xp.size * cbytes + (w1p.size + w2p.size) * cbytes
                      + (b1p.size + gp.size + bep.size + maskp.size + b2p.size) * 4
                      + bp * op * obytes)

    kernel = functools.partial(mlp_kernel, hidden_true=hidden,
                               use_mask=(hp != hidden), compute_dtype=compute_dtype)

    def resident(shape):
        # Constant index_map -> never re-DMA'd; single buffer avoids the default 2x VMEM.
        return pl.BlockSpec(shape, lambda i: (0, 0), pipeline_mode=pl.Buffered(1))

    out = pl.pallas_call(
        kernel,
        out_shape=jax.ShapeDtypeStruct((bp, op), out_dtype),
        grid=grid,
        in_specs=[
            pl.BlockSpec((tm, dp), lambda i: (i, 0)),   # x: tiled over batch (pipelined)
            resident((dp, hp)),                          # w1
            resident((1, hp)),                           # b1
            resident((1, hp)),                           # gamma
            resident((1, hp)),                           # beta
            resident((1, hp)),                           # LN padding mask
            resident((hp, op)),                          # w2
            resident((1, op)),                           # b2
        ],
        out_specs=pl.BlockSpec((tm, op), lambda i: (i, 0)),
        compiler_params=pltpu.CompilerParams(
            dimension_semantics=("parallel",),
            vmem_limit_bytes=vmem_limit),
        cost_estimate=pl.CostEstimate(
            flops=flops, transcendentals=bp, bytes_accessed=bytes_accessed),
    )(xp, w1p, b1p, gp, bep, maskp, w2p, b2p)

    return out[:B, :meta["d_out"]]


def mlp_layer(x, w1, b1, gamma, beta, w2, b2, *,
              compute_dtype=jnp.bfloat16, block_batch=None, out_dtype=jnp.float32):
    """Convenience wrapper: prepare (pad/cast) params then run the fused kernel.

    For repeated calls with the same parameters, call prepare_params() once and
    reuse it with mlp_layer_prepared() to avoid re-padding weights every forward.
    """
    prepared, meta = prepare_params(w1, b1, gamma, beta, w2, b2,
                                    compute_dtype=compute_dtype)
    return mlp_layer_prepared(x, prepared, meta,
                              block_batch=block_batch, out_dtype=out_dtype)


# ---------------------------------------------------------------------------
# Reference + test
# ---------------------------------------------------------------------------
def init_params(key, input_dim, hidden_dim, output_dim):
    """Deterministic synthetic parameter init (shapes match the PyTorch module)."""
    k1, k2, k3, k4 = jax.random.split(key, 4)
    w1 = jax.random.normal(k1, (input_dim, hidden_dim), jnp.float32) * 0.05
    b1 = jax.random.normal(k2, (1, hidden_dim), jnp.float32) * 0.01
    gamma = jnp.ones((1, hidden_dim), jnp.float32)
    beta = jnp.zeros((1, hidden_dim), jnp.float32)
    w2 = jax.random.normal(k3, (hidden_dim, output_dim), jnp.float32) * 0.05
    b2 = jax.random.normal(k4, (1, output_dim), jnp.float32) * 0.01
    return w1, b1, gamma, beta, w2, b2


def mlp_ref(x, w1, b1, gamma, beta, w2, b2):
    h = x @ w1 + b1
    mean = jnp.mean(h, axis=-1, keepdims=True)
    var = jnp.mean((h - mean) ** 2, axis=-1, keepdims=True)
    h = (h - mean) / jnp.sqrt(var + LN_EPS) * gamma + beta
    h = jnp.maximum(h, 0.0)
    return h @ w2 + b2


if __name__ == "__main__":
    key = jax.random.PRNGKey(0)
    kx, kp = jax.random.split(key)

    batch, input_dim, hidden_dim, output_dim = 8, 32, 64, 16
    x = jax.random.normal(kx, (batch, input_dim), jnp.float32)
    params = init_params(kp, input_dim, hidden_dim, output_dim)
    ref = mlp_ref(x, *params)

    # bf16 MXU path (default perf path on v5e/v6e/v7x), f32 accumulate / LN / ReLU.
    prepared_bf16, meta_bf16 = prepare_params(*params, compute_dtype=jnp.bfloat16)
    out_bf16 = mlp_layer_prepared(x, prepared_bf16, meta_bf16)
    jax.block_until_ready(out_bf16)
    assert out_bf16.shape == (batch, output_dim)
    assert jnp.allclose(out_bf16, ref, atol=5e-2, rtol=5e-2), "bf16 mismatch vs JAX reference"

    # f32 MXU debug path (tight tolerance).
    out_f32 = mlp_layer(x, *params, compute_dtype=jnp.float32)
    jax.block_until_ready(out_f32)
    assert out_f32.shape == (batch, output_dim)
    assert jnp.allclose(out_f32, ref, atol=1e-4, rtol=1e-4), "f32 mismatch vs JAX reference"

    print("KERNEL_OK")
</pallas_src>

<mosaic_0001>
module attributes {stable_mosaic.version = 11 : i64} {
  func.func @mlp_kernel(%arg0: i32, %arg1: memref<16x128xbf16, #tpu.memory_space<vmem>>, %arg2: memref<128x128xbf16, #tpu.memory_space<vmem>>, %arg3: memref<1x128xf32, #tpu.memory_space<vmem>>, %arg4: memref<1x128xf32, #tpu.memory_space<vmem>>, %arg5: memref<1x128xf32, #tpu.memory_space<vmem>>, %arg6: memref<1x128xf32, #tpu.memory_space<vmem>>, %arg7: memref<128x128xbf16, #tpu.memory_space<vmem>>, %arg8: memref<1x128xf32, #tpu.memory_space<vmem>>, %arg9: memref<16x128xf32, #tpu.memory_space<vmem>>) attributes {dimension_semantics = [#tpu.dimension_semantics<parallel>], iteration_bounds = array<i64: 1>, scalar_prefetch = 0 : i64, scratch_operands = 0 : i64, tpu.core_type = #tpu.core_type<tc>, window_params = [{transform_indices = @transform_0, window_bounds = array<i64: 16, 128>}, {pipeline_mode = #tpu.pipeline_mode<synchronous>, transform_indices = @transform_1, window_bounds = array<i64: 128, 128>}, {pipeline_mode = #tpu.pipeline_mode<synchronous>, transform_indices = @transform_2, window_bounds = array<i64: 1, 128>}, {pipeline_mode = #tpu.pipeline_mode<synchronous>, transform_indices = @transform_3, window_bounds = array<i64: 1, 128>}, {pipeline_mode = #tpu.pipeline_mode<synchronous>, transform_indices = @transform_4, window_bounds = array<i64: 1, 128>}, {pipeline_mode = #tpu.pipeline_mode<synchronous>, transform_indices = @transform_5, window_bounds = array<i64: 1, 128>}, {pipeline_mode = #tpu.pipeline_mode<synchronous>, transform_indices = @transform_6, window_bounds = array<i64: 128, 128>}, {pipeline_mode = #tpu.pipeline_mode<synchronous>, transform_indices = @transform_7, window_bounds = array<i64: 1, 128>}, {transform_indices = @transform_8, window_bounds = array<i64: 16, 128>}]} {
    %c0 = arith.constant 0 : index
    %c0_0 = arith.constant 0 : index
    %0 = vector.load %arg1[%c0, %c0_0] : memref<16x128xbf16, #tpu.memory_space<vmem>>, vector<16x128xbf16>
    %c0_1 = arith.constant 0 : index
    %c0_2 = arith.constant 0 : index
    %1 = vector.load %arg2[%c0_1, %c0_2] : memref<128x128xbf16, #tpu.memory_space<vmem>>, vector<128x128xbf16>
    %cst = arith.constant dense<0.000000e+00> : vector<16x128xf32>
    %2 = tpu.matmul %0, %1, %cst {dimension_numbers = #tpu.dot_dimension_numbers<[1], [0], [0], [1], [0, 0, 1, 1], [], []>} : vector<16x128xbf16>, vector<128x128xbf16>, vector<16x128xf32> -> vector<16x128xf32>
    %c0_3 = arith.constant 0 : index
    %c0_4 = arith.constant 0 : index
    %3 = vector.load %arg3[%c0_3, %c0_4] : memref<1x128xf32, #tpu.memory_space<vmem>>, vector<1x128xf32>
    %4 = vector.broadcast %3 : vector<1x128xf32> to vector<16x128xf32>
    %5 = arith.addf %2, %4 : vector<16x128xf32>
    %cst_5 = arith.constant dense<0.000000e+00> : vector<16xf32>
    %6 = vector.multi_reduction <add>, %5, %cst_5 [1] : vector<16x128xf32> to vector<16xf32>
    %7 = vector.shape_cast %6 : vector<16xf32> to vector<16x1xf32>
    %cst_6 = arith.constant 1.562500e-02 : f32
    %8 = vector.broadcast %cst_6 : f32 to vector<16x1xf32>
    %9 = arith.mulf %7, %8 : vector<16x1xf32>
    %10 = vector.broadcast %9 : vector<16x1xf32> to vector<16x128xf32>
    %11 = arith.subf %5, %10 : vector<16x128xf32>
    %c0_7 = arith.constant 0 : index
    %c0_8 = arith.constant 0 : index
    %12 = vector.load %arg6[%c0_7, %c0_8] : memref<1x128xf32, #tpu.memory_space<vmem>>, vector<1x128xf32>
    %13 = vector.broadcast %12 : vector<1x128xf32> to vector<16x128xf32>
    %14 = arith.mulf %11, %13 : vector<16x128xf32>
    %15 = arith.mulf %14, %14 : vector<16x128xf32>
    %cst_9 = arith.constant dense<0.000000e+00> : vector<16xf32>
    %16 = vector.multi_reduction <add>, %15, %cst_9 [1] : vector<16x128xf32> to vector<16xf32>
    %17 = vector.shape_cast %16 : vector<16xf32> to vector<16x1xf32>
    %cst_10 = arith.constant 1.562500e-02 : f32
    %18 = vector.broadcast %cst_10 : f32 to vector<16x1xf32>
    %19 = arith.mulf %17, %18 : vector<16x1xf32>
    %cst_11 = arith.constant 9.99999974E-6 : f32
    %20 = vector.broadcast %cst_11 : f32 to vector<16x1xf32>
    %21 = arith.addf %19, %20 : vector<16x1xf32>
    %22 = math.rsqrt %21 : vector<16x1xf32>
    %23 = vector.broadcast %22 : vector<16x1xf32> to vector<16x128xf32>
    %24 = arith.mulf %14, %23 : vector<16x128xf32>
    %c0_12 = arith.constant 0 : index
    %c0_13 = arith.constant 0 : index
    %25 = vector.load %arg4[%c0_12, %c0_13] : memref<1x128xf32, #tpu.memory_space<vmem>>, vector<1x128xf32>
    %26 = vector.broadcast %25 : vector<1x128xf32> to vector<16x128xf32>
    %27 = arith.mulf %24, %26 : vector<16x128xf32>
    %c0_14 = arith.constant 0 : index
    %c0_15 = arith.constant 0 : index
    %28 = vector.load %arg5[%c0_14, %c0_15] : memref<1x128xf32, #tpu.memory_space<vmem>>, vector<1x128xf32>
    %29 = vector.broadcast %28 : vector<1x128xf32> to vector<16x128xf32>
    %30 = arith.addf %27, %29 : vector<16x128xf32>
    %cst_16 = arith.constant 0.000000e+00 : f32
    %31 = vector.broadcast %cst_16 : f32 to vector<16x128xf32>
    %32 = arith.maximumf %30, %31 : vector<16x128xf32>
    %33 = arith.truncf %32 : vector<16x128xf32> to vector<16x128xbf16>
    %c0_17 = arith.constant 0 : index
    %c0_18 = arith.constant 0 : index
    %34 = vector.load %arg7[%c0_17, %c0_18] : memref<128x128xbf16, #tpu.memory_space<vmem>>, vector<128x128xbf16>
    %cst_19 = arith.constant dense<0.000000e+00> : vector<16x128xf32>
    %35 = tpu.matmul %33, %34, %cst_19 {dimension_numbers = #tpu.dot_dimension_numbers<[1], [0], [0], [1], [0, 0, 1, 1], [], []>} : vector<16x128xbf16>, vector<128x128xbf16>, vector<16x128xf32> -> vector<16x128xf32>
    %c0_20 = arith.constant 0 : index
    %c0_21 = arith.constant 0 : index
    %36 = vector.load %arg8[%c0_20, %c0_21] : memref<1x128xf32, #tpu.memory_space<vmem>>, vector<1x128xf32>
    %37 = vector.broadcast %36 : vector<1x128xf32> to vector<16x128xf32>
    %38 = arith.addf %35, %37 : vector<16x128xf32>
    %c0_22 = arith.constant 0 : index
    %c0_23 = arith.constant 0 : index
    %39 = vector.load %arg9[%c0_22, %c0_23] : memref<16x128xf32, #tpu.memory_space<vmem>>, vector<16x128xf32>
    tpu.vector_store %arg9[%c0_22, %c0_23], %38 {strides = array<i32>} : memref<16x128xf32, #tpu.memory_space<vmem>>, vector<16x128xf32>,
    return
  }
  func.func @transform_0(%arg0: i32) -> (i32, i32) {
    %c0_i32 = arith.constant 0 : i32
    %c0_i32_0 = arith.constant 0 : i32
    return %arg0, %c0_i32 : i32, i32
  }
  func.func @transform_1(%arg0: i32) -> (i32, i32) {
    %c0_i32 = arith.constant 0 : i32
    %c0_i32_0 = arith.constant 0 : i32
    %c0_i32_1 = arith.constant 0 : i32
    return %c0_i32, %c0_i32_0 : i32, i32
  }
  func.func @transform_2(%arg0: i32) -> (i32, i32) {
    %c0_i32 = arith.constant 0 : i32
    %c0_i32_0 = arith.constant 0 : i32
    %c0_i32_1 = arith.constant 0 : i32
    return %c0_i32, %c0_i32_0 : i32, i32
  }
  func.func @transform_3(%arg0: i32) -> (i32, i32) {
    %c0_i32 = arith.constant 0 : i32
    %c0_i32_0 = arith.constant 0 : i32
    %c0_i32_1 = arith.constant 0 : i32
    return %c0_i32, %c0_i32_0 : i32, i32
  }
  func.func @transform_4(%arg0: i32) -> (i32, i32) {
    %c0_i32 = arith.constant 0 : i32
    %c0_i32_0 = arith.constant 0 : i32
    %c0_i32_1 = arith.constant 0 : i32
    return %c0_i32, %c0_i32_0 : i32, i32
  }
  func.func @transform_5(%arg0: i32) -> (i32, i32) {
    %c0_i32 = arith.constant 0 : i32
    %c0_i32_0 = arith.constant 0 : i32
    %c0_i32_1 = arith.constant 0 : i32
    return %c0_i32, %c0_i32_0 : i32, i32
  }
  func.func @transform_6(%arg0: i32) -> (i32, i32) {
    %c0_i32 = arith.constant 0 : i32
    %c0_i32_0 = arith.constant 0 : i32
    %c0_i32_1 = arith.constant 0 : i32
    return %c0_i32, %c0_i32_0 : i32, i32
  }
  func.func @transform_7(%arg0: i32) -> (i32, i32) {
    %c0_i32 = arith.constant 0 : i32
    %c0_i32_0 = arith.constant 0 : i32
    %c0_i32_1 = arith.constant 0 : i32
    return %c0_i32, %c0_i32_0 : i32, i32
  }
  func.func @transform_8(%arg0: i32) -> (i32, i32) {
    %c0_i32 = arith.constant 0 : i32
    %c0_i32_0 = arith.constant 0 : i32
    return %arg0, %c0_i32 : i32, i32
  }
}

</mosaic_0001>

<bundles_post_ra>
// kernel: tpu_custom_call.1
= control target key start
LH: loop header
LB: loop body
LE: loop exit
PB: predicated region body
PF: predicated region fallthrough
CT: control target
= control target key end

     0   :  { %13 = vsyncpa [#allocation3], 0  ;;  %s733_s0 = inlined_call_operand.hbm [shape: bf16[16,128], index: 0, kind: input, shape index: {}]   ;;  %s734_s1 = inlined_call_operand.hbm [shape: bf16[128,128], index: 1, kind: input, shape index: {}]   ;;  %s735_s2 = inlined_call_operand.vmem [shape: f32[1,128], index: 2, kind: input, shape index: {}]   ;;  %s736_s3 = inlined_call_operand.vmem [shape: f32[1,128], index: 3, kind: input, shape index: {}]   ;;  %s737_s4 = inlined_call_operand.vmem [shape: f32[1,128], index: 4, kind: input, shape index: {}]   ;;  %s738_s5 = inlined_call_operand.vmem [shape: f32[1,128], index: 5, kind: input, shape index: {}]   ;;  %s739_s6 = inlined_call_operand.hbm [shape: bf16[128,128], index: 6, kind: input, shape index: {}]   ;;  %s740_s7 = inlined_call_operand.vmem [shape: f32[1,128], index: 7, kind: input, shape index: {}]   ;;  %s741_s8 = inlined_call_operand.hbm [shape: f32[16,128], index: 8, kind: output, shape index: {}]  }
   0x1   :  { %14 = vsyncpa [#allocation6], 0 }
   0x2   :  { %15 = vsyncpa [#allocation4], 0  ;;  %s581_s27 = smov [#allocation5]   ;;  %s582_s29 = smov [#allocation2]  }
   0x3   :  { %s33_s28 = sshll.u32 %s581_s27, 4  ;;  %s21_s30 = sshll.u32 %s582_s29, 4  ;;  %s34_s28 = int_to_ptr.vmem [resolvable:$true] %s33_s28  ;;  %s636_s30 = int_to_ptr.vmem [resolvable:$true] %s21_s30 }
   0x4   :  { %s487_s11 = scalar_lea.hbm %s734_s1, 1024 }
   0x5   :  { %p488_p0 = scmp.ne.s32.totalorder %s734_s1, %s487_s11  ;;  %p491_p1 = scmp.lt.u32.totalorder %s487_s11, %s734_s1 }
   0x7   :  { %p493_p2 = pnand %p491_p1, %p488_p0 }
   0x9   :  { %496 = shalt.err (!%p493_p2)
}
   0xa   :  { %s497_s16 = scalar_lea.vmem %s34_s28, 1024  ;;  %p502_p4 = scmp.lt.s32.totalorder %s34_s28, %s34_s28 }
   0xb   :  { %p498_p3 = scmp.ne.s32.totalorder %s34_s28, %s497_s16  ;;  %p503_p5 = scmp.lt.s32.totalorder %s497_s16, %s497_s16 }
   0xd   :  { %p504_p6 = por %p503_p5, %p502_p4 }
   0xf   :  { %p505_p7 = pnand %p504_p6, %p498_p3 }
  0x11   :  { %508 = shalt.err (!%p505_p7)
}
  0x12   :  { %s583_s17 = smov 64   ;;  %s584_s18 = smov 4  }
  0x13   :  { %39 = dma.hbm_to_vmem [thread:$0]  %s734_s1, 1024, %s34_s28, [#allocation6], %s583_s17, %s583_s17, %s584_s18  }
  0x14   :  { %s509_s23 = scalar_lea.hbm %s733_s0, 128 }
  0x15   :  { %p510_p8 = scmp.ne.s32.totalorder %s733_s0, %s509_s23  ;;  %p513_p9 = scmp.lt.u32.totalorder %s509_s23, %s733_s0 }
  0x17   :  { %p515_p10 = pnand %p513_p9, %p510_p8 }
  0x19   :  { %518 = shalt.err (!%p515_p10)
}
  0x1a   :  { %s519_s29 = scalar_lea.vmem %s636_s30, 128  ;;  %p524_p12 = scmp.lt.s32.totalorder %s636_s30, %s636_s30 }
  0x1b   :  { %p520_p11 = scmp.ne.s32.totalorder %s636_s30, %s519_s29  ;;  %p525_p13 = scmp.lt.s32.totalorder %s519_s29, %s519_s29 }
  0x1d   :  { %p526_p0 = por %p525_p13, %p524_p12 }
  0x1f   :  { %p527_p1 = pnand %p526_p0, %p520_p11 }
  0x21   :  { %530 = shalt.err (!%p527_p1)
}
  0x22   :  { %27 = dma.hbm_to_vmem [thread:$0]  %s733_s0, 128, %s636_s30, [#allocation3], %s583_s17, %s583_s17, %s584_s18  }
  0x23   :  { %s585_s9 = smov [#allocation7]   ;;  %s531_s13 = scalar_lea.hbm %s739_s6, 1024 }
  0x24   :  { %s53_s10 = sshll.u32 %s585_s9, 4  ;;  %p532_p2 = scmp.ne.s32.totalorder %s739_s6, %s531_s13  ;;  %s54_s10 = int_to_ptr.vmem [resolvable:$true] %s53_s10 }
  0x25   :  { %p535_p3 = scmp.lt.u32.totalorder %s531_s13, %s739_s6 }
  0x27   :  { %p537_p4 = pnand %p535_p3, %p532_p2 }
  0x29   :  { %540 = shalt.err (!%p537_p4)
}
  0x2a   :  { %s541_s20 = scalar_lea.vmem %s54_s10, 1024  ;;  %p546_p6 = scmp.lt.s32.totalorder %s54_s10, %s54_s10 }
  0x2b   :  { %p542_p5 = scmp.ne.s32.totalorder %s54_s10, %s541_s20  ;;  %p547_p7 = scmp.lt.s32.totalorder %s541_s20, %s541_s20 }
  0x2d   :  { %p548_p8 = por %p547_p7, %p546_p6 }
  0x2f   :  { %p549_p9 = pnand %p548_p8, %p542_p5 }
  0x31   :  { %552 = shalt.err (!%p549_p9)
}
  0x32   :  { %59 = dma.hbm_to_vmem [thread:$0]  %s739_s6, 1024, %s54_s10, [#allocation6], %s583_s17, %s583_s17, %s584_s18  }
  0x33   :  { %575 = dma.done.wait [#allocation3], 128  }
  0x34   :  { %576 = vsyncadd [#allocation3], 4294967168 }
  0x35   :  { %577 = dma.done.wait [#allocation6], 2048  }
  0x36   :  { %578 = vsyncadd [#allocation6], 4294965248  ;;  %v586_v0 = vmov 0.0   ;;  %vm587_vm0 = vmmov 0   ;;  %v466_v1 = vld [vmem:[#allocation5] sm:$0xff]   ;;  %v467_v2 = vld [vmem:[#allocation5 + $0x8] sm:$0xff]  }
  0x37   :  { %416 = vmatprep.subr.bf16.mxu0 %v586_v0  ;;  %432 = vmatprep.mubr.msk.bf16.mxu0 %vm587_vm0, %v586_v0  ;;  %v468_v3 = vld [vmem:[#allocation5 + $0x10] sm:$0xff]   ;;  %v469_v4 = vld [vmem:[#allocation5 + $0x18] sm:$0xff]   ;;  %v470_v5 = vld [vmem:[#allocation5 + $0x20] sm:$0xff]  }
  0x38   :  { %436 = vmatprep.subr.bf16.mxu1 %v586_v0  ;;  %452 = vmatprep.mubr.msk.bf16.mxu1 %vm587_vm0, %v586_v0  ;;  %v471_v6 = vld [vmem:[#allocation5 + $0x28] sm:$0xff]   ;;  %v472_v7 = vld [vmem:[#allocation5 + $0x30] sm:$0xff]   ;;  %v473_v8 = vld [vmem:[#allocation5 + $0x38] sm:$0xff]  }
  0x39   :  { %417 = vmatpush3.bf16.msra.mxu0 %v466_v1  ;;  %v474_v9 = vld [vmem:[#allocation2] sm:$0xff]   ;;  %v475_v17 = vld [vmem:[#allocation7] sm:$0xff]   ;;  %v476_v29 = vld [vmem:[#allocation7 + $0x8] sm:$0xff]  }
  0x3a   :  { %418 = vmatprep.subr.bf16.mxu0 %v586_v0  ;;  %v376_v10 = vld [vmem:[%s735_s2] ss:$0 sm:$0xff]  ;;  %437 = vmatpush3.bf16.msra.mxu1 %v475_v17  ;;  %v477_v30 = vld [vmem:[#allocation7 + $0x10] sm:$0xff]   ;;  %v479_v32 = vld [vmem:[#allocation7 + $0x20] sm:$0xff]  }
  0x3b   :  { %438 = vmatprep.subr.bf16.mxu1 %v586_v0  ;;  %v386_v20 = vld [vmem:[%s738_s5] ss:$0 sm:$0xff]  ;;  %v480_v33 = vld [vmem:[#allocation7 + $0x28] sm:$0xff]   ;;  %v481_v34 = vld [vmem:[#allocation7 + $0x30] sm:$0xff]  }
  0x3c   :  { %v478_v31 = vld [vmem:[#allocation7 + $0x18] sm:$0xff]  }
  0x3d   :  { %419 = vmatpush3.bf16.msra.mxu0 %v467_v2  ;;  %v482_v35 = vld [vmem:[#allocation7 + $0x38] sm:$0xff]  }
  0x3e   :  { %420 = vmatprep.subr.bf16.mxu0 %v586_v0  ;;  %439 = vmatpush3.bf16.msra.mxu1 %v476_v29  ;;  %v387_v43 = vld [vmem:[%s736_s3] ss:$0 sm:$0xff]  ;;  %s588_s3 = smov [#allocation8]  }
  0x3f   :  { %440 = vmatprep.subr.bf16.mxu1 %v586_v0  ;;  %v388_v47 = vld [vmem:[%s737_s4] ss:$0 sm:$0xff]  ;;  %s363_s26 = sshll.u32 %s588_s3, 4  ;;  %s364_s26 = int_to_ptr.vmem [resolvable:$true] %s363_s26 }
  0x40   :  { %v389_v55 = vld [vmem:[%s740_s7] ss:$0 sm:$0xff]  ;;  %s553_s4 = scalar_lea.vmem %s364_s26, 256  ;;  %p558_p11 = scmp.lt.s32.totalorder %s364_s26, %s364_s26 }
  0x41   :  { %421 = vmatpush3.bf16.msra.mxu0 %v468_v3  ;;  %p554_p10 = scmp.ne.s32.totalorder %s364_s26, %s553_s4  ;;  %p559_p12 = scmp.lt.s32.totalorder %s553_s4, %s553_s4 }
  0x42   :  { %422 = vmatprep.subr.bf16.mxu0 %v586_v0  ;;  %441 = vmatpush3.bf16.msra.mxu1 %v477_v30 }
  0x43   :  { %442 = vmatprep.subr.bf16.mxu1 %v586_v0  ;;  %p560_p13 = por %p559_p12, %p558_p11 }
  0x45   :  { %423 = vmatpush3.bf16.msra.mxu0 %v469_v4  ;;  %p561_p0 = pnand %p560_p13, %p554_p10 }
  0x46   :  { %424 = vmatprep.subr.bf16.mxu0 %v586_v0  ;;  %443 = vmatpush3.bf16.msra.mxu1 %v478_v31 }
  0x47   :  { %444 = vmatprep.subr.bf16.mxu1 %v586_v0 }
  0x49   :  { %425 = vmatpush3.bf16.msra.mxu0 %v470_v5 }
  0x4a   :  { %426 = vmatprep.subr.bf16.mxu0 %v586_v0  ;;  %445 = vmatpush3.bf16.msra.mxu1 %v479_v32 }
  0x4b   :  { %446 = vmatprep.subr.bf16.mxu1 %v586_v0 }
  0x4d   :  { %427 = vmatpush3.bf16.msra.mxu0 %v471_v6 }
  0x4e   :  { %428 = vmatprep.subr.bf16.mxu0 %v586_v0  ;;  %447 = vmatpush3.bf16.msra.mxu1 %v480_v33 }
  0x4f   :  { %448 = vmatprep.subr.bf16.mxu1 %v586_v0 }
  0x51   :  { %429 = vmatpush3.bf16.msra.mxu0 %v472_v7 }
  0x52   :  { %430 = vmatprep.subr.bf16.mxu0 %v586_v0  ;;  %449 = vmatpush3.bf16.msra.mxu1 %v481_v34 }
  0x53   :  { %450 = vmatprep.subr.bf16.mxu1 %v586_v0 }
  0x55   :  { %431 = vmatpush3.bf16.msra.mxu0 %v473_v8 }
  0x56   :  { %451 = vmatpush3.bf16.msra.mxu1 %v482_v35 }
  0x58   :  { %433 = vmatmul.mubr.bf16.vlgmr.msra.gmra.mrb[0].mxu0 %v474_v9 }
 0x12b   :  { %v185_v11 = vpop.f32.mrb[0].mxu0 }
 0x12c   :  { %v186_v12 = vadd.f32 %v376_v10, %v185_v11  ;;  %v434_v13 = vpop.f32.mrb[1].mxu0 }
 0x12d   :  { %v188_v14 = vpop.f32.mrb[2].mxu0 }
 0x12e   :  { %192 = vadd.xlane.f32.xlu0 %v186_v12  ;;  %v435_v15 = vpop.f32.mrb[3].mxu0  ;;  %v189_v16 = vadd.f32 %v376_v10, %v188_v14 }
 0x132   :  { %194 = vadd.xlane.f32.xlu0 %v189_v16 }
 0x1bb   :  { %v193_v18 = vpop.xlane.xlu0 %192 }
 0x1bc   :  { %v196_v19 = vmul.f32 0.015625, %v193_v18 }
 0x1be   :  { %v198_v21 = vsub.f32 %v186_v12, %v196_v19 }
 0x1bf   :  { %v195_v22 = vpop.xlane.xlu0 %194 }
 0x1c0   :  { %v197_v23 = vmul.f32 0.015625, %v195_v22  ;;  %v207_v24 = vmul.f32 %v386_v20, %v198_v21 }
 0x1c2   :  { %v199_v25 = vsub.f32 %v189_v16, %v197_v23  ;;  %v209_v26 = vmul.f32 %v207_v24, %v207_v24 }
 0x1c4   :  { %211 = vadd.xlane.f32.xlu1 %v209_v26  ;;  %v208_v27 = vmul.f32 %v386_v20, %v199_v25 }
 0x1c6   :  { %v210_v28 = vmul.f32 %v208_v27, %v208_v27 }
 0x1c8   :  { %213 = vadd.xlane.f32.xlu1 %v210_v28 }
 0x251   :  { %v212_v36 = vpop.xlane.xlu1 %211 }
 0x252   :  { %v215_v37 = vmul.f32 0.015625, %v212_v36 }
 0x254   :  { %v217_v38 = vadd.f32 1e-05, %v215_v37 }
 0x255   :  { %v214_v39 = vpop.xlane.xlu1 %213 }
 0x256   :  { %483 = vrsqrt.f32 %v217_v38  ;;  %v216_v40 = vmul.f32 0.015625, %v214_v39 }
 0x258   :  { %v218_v41 = vadd.f32 1e-05, %v216_v40 }
 0x25a   :  { %485 = vrsqrt.f32 %v218_v41 }
 0x260   :  { %v484_v42 = vpop.eup %483 }
 0x261   :  { %v221_v44 = vmul.f32 %v484_v42, %v207_v24 }
 0x263   :  { %v230_v45 = vmul.f32 %v387_v43, %v221_v44 }
 0x264   :  { %v486_v46 = vpop.eup %485 }
 0x265   :  { %v222_v48 = vmul.f32 %v486_v46, %v208_v27  ;;  %v239_v50 = vadd.f32 %v388_v47, %v230_v45 }
 0x267   :  { %v231_v49 = vmul.f32 %v387_v43, %v222_v48  ;;  %v241_v52 = vmax.f32 %v239_v50, 0.0 }
 0x269   :  { %v240_v51 = vadd.f32 %v388_v47, %v231_v49 }
 0x26b   :  { %v242_v53 = vmax.f32 %v240_v51, 0.0 }
 0x26d   :  { %v243_v54 = vpack.c.bf16 %v242_v53, %v241_v52 }
 0x26f   :  { %453 = vmatmul.mubr.bf16.vlgmr.msra.gmra.mrb[0].mxu1 %v243_v54 }
 0x342   :  { %v349_v56 = vpop.f32.mrb[0].mxu1 }
 0x343   :  { %v350_v57 = vadd.f32 %v389_v55, %v349_v56  ;;  %v454_v58 = vpop.f32.mrb[1].mxu1 }
 0x344   :  { %v352_v59 = vpop.f32.mrb[2].mxu1 }
 0x345   :  { %356 = vst [vmem:[#allocation8] sm:$0xff] %v350_v57  ;;  %v353_v60 = vadd.f32 %v389_v55, %v352_v59  ;;  %v455_v61 = vpop.f32.mrb[3].mxu1 }
 0x347   :  { %357 = vst [vmem:[#allocation8 + $0x8] sm:$0xff] %v353_v60 }
 0x348   :  { %564 = shalt.err (!%p561_p0)
}
 0x349   :  { %s565_s29 = scalar_lea.hbm %s741_s8, 256 }
 0x34a   :  { %p566_p1 = scmp.ne.s32.totalorder %s741_s8, %s565_s29  ;;  %p569_p2 = scmp.lt.u32.totalorder %s565_s29, %s741_s8 }
 0x34c   :  { %p571_p3 = pnand %p569_p2, %p566_p1 }
 0x34e   :  { %574 = shalt.err (!%p571_p3)
}
 0x34f   :  { %s589_s11 = smov 128   ;;  %s590_s12 = smov 8  }
 0x350   :  { %369 = dma.vmem_to_hbm [thread:$0]  %s364_s26, 256, %s741_s8, [#allocation4], %s589_s11, %s589_s11, %s590_s12  }
 0x351   :  { %579 = dma.done.wait [#allocation4], 256  }
 0x352   :  { %580 = vsyncadd [#allocation4], 4294967040 }
 0x353   :  { %373 = vsyncpa [#allocation3], 1 }
 0x354   :  { %374 = vsyncpa [#allocation6], 1 }
 0x355   :  { %375 = vsyncpa [#allocation4], 1 }

</bundles_post_ra>
